<compile_context>
chip_gen: v6e
topology: v6e:2x2x1
jax: 0.10.0
libtpu: 0.0.40
codegen_flags: <defaults>
</compile_context>

<pallas_src>
import functools

import jax
import jax.numpy as jnp
from jax.experimental import pallas as pl
from jax.experimental.pallas import tpu as pltpu


def _pick_tile(dim, preferred, aligns=(128,)):
    """Largest divisor of `dim` that is <= `preferred` and a multiple of one of
    `aligns` (tried in order).  Falls back to the full axis (always legal)."""
    if dim <= preferred:
        return dim
    for align in aligns:
        if dim % align:
            continue
        t = (min(preferred, dim) // align) * align
        while t >= align:
            if dim % t == 0:
                return t
            t -= align
    # No aligned divisor <= preferred exists; the whole axis is the only legal
    # simple block.  TODO(synk): masked edge blocks for ragged dims.
    return dim


def _select_config():
    """Per-generation tile sizes / VMEM budget for the fused head+loss kernel."""
    kind = ""
    try:
        kind = jax.devices()[0].device_kind.lower()
    except Exception:
        pass
    if "v7" in kind:
        # v7x: 64 MiB VMEM per TensorCore -> ~25 MiB working set, cap the limit.
        cfg = dict(tm=1024, tn=1024, tk=1024, vmem=52 * 1024 * 1024)
    elif "v6" in kind:
        # v6e: 128 MiB VMEM; 2048-class tiles make the matmul MXU-bound.
        cfg = dict(tm=2048, tn=2048, tk=1024, vmem=110 * 1024 * 1024)
    elif "v5e" in kind or "v5 lite" in kind or "v5lite" in kind:
        # v5e: 197 TF/s vs 0.82 TB/s -> 512x1024 is already compute-bound.
        cfg = dict(tm=512, tn=1024, tk=512, vmem=64 * 1024 * 1024)
    else:
        # Conservative default that fits every generation's VMEM.
        cfg = dict(tm=512, tn=1024, tk=512, vmem=64 * 1024 * 1024)
    try:  # cap the requested limit to ~85% of physical VMEM when queryable
        cap = int(pltpu.get_tpu_info().vmem_capacity_bytes)
        cfg["vmem"] = min(cfg["vmem"], int(cap * 0.85))
    except Exception:
        pass
    return cfg


# ----------------------------------------------------------------------------
# Fused kernel: tuned lm_head matmul + CE / KL losses (online softmax over the
# vocab grid axis, computed on the f32 accumulator).
# ----------------------------------------------------------------------------
def fused_head_loss_kernel(h_ref, w_ref, p_ref, lbl_ref, msk_ref,        # in
                           o_ref, ce_ref, cnt_ref, kl_ref,               # out
                           acc_ref, mq_ref, sq_ref, sqt_ref,             # scratch
                           mp_ref, sp_ref, num_ref, pick_ref,
                           *, inv_temp):
    j = pl.program_id(1)
    k = pl.program_id(2)
    nj = pl.num_programs(1)
    nk = pl.num_programs(2)

    # per-row-block init of the online-softmax running statistics
    @pl.when(jnp.logical_and(j == 0, k == 0))
    def _():
        mq_ref[...] = jnp.zeros_like(mq_ref) - 1e30
        mp_ref[...] = jnp.zeros_like(mp_ref) - 1e30
        sq_ref[...] = jnp.zeros_like(sq_ref)
        sqt_ref[...] = jnp.zeros_like(sqt_ref)
        sp_ref[...] = jnp.zeros_like(sp_ref)
        num_ref[...] = jnp.zeros_like(num_ref)
        pick_ref[...] = jnp.zeros_like(pick_ref)

    # per-(row, vocab)-block init of the matmul accumulator
    @pl.when(k == 0)
    def _():
        acc_ref[...] = jnp.zeros_like(acc_ref)

    acc_ref[...] += jnp.dot(h_ref[...], w_ref[...],
                            preferred_element_type=jnp.float32)

    @pl.when(k == nk - 1)
    def _():
        q = acc_ref[...]                       # (tm, tn) f32 tuned-head logits
        o_ref[...] = q.astype(o_ref.dtype)     # bf16 target_logits tile

        p = p_ref[...].astype(jnp.float32)     # frozen base-model logits
        labels = lbl_ref[...]                  # (tm, 1) int32, shifted, -100 pad
        tm, tn = q.shape

        # --- cross-entropy stats: lse(q), lse(q/T), q[label] (online) -------
        m_old = mq_ref[...]
        m_new = jnp.maximum(m_old, jnp.max(q, axis=-1, keepdims=True))
        alpha = jnp.exp(m_old - m_new)
        alpha_t = jnp.exp((m_old - m_new) * inv_temp)
        sq_new = alpha * sq_ref[...] + jnp.sum(
            jnp.exp(q - m_new), axis=-1, keepdims=True)
        sqt_new = alpha_t * sqt_ref[...] + jnp.sum(
            jnp.exp((q - m_new) * inv_temp), axis=-1, keepdims=True)
        col = j * tn + jax.lax.broadcasted_iota(jnp.int32, (tm, tn), 1)
        pick_new = pick_ref[...] + jnp.sum(
            jnp.where(col == labels, q, 0.0), axis=-1, keepdims=True)
        mq_ref[...] = m_new
        sq_ref[...] = sq_new
        sqt_ref[...] = sqt_new
        pick_ref[...] = pick_new

        # --- KL(softmax(p/T) || softmax(q/T)) stats (online) ----------------
        pt = p * inv_temp
        qt = q * inv_temp
        mp_old = mp_ref[...]
        mp_new = jnp.maximum(mp_old, jnp.max(pt, axis=-1, keepdims=True))
        beta = jnp.exp(mp_old - mp_new)
        e_p = jnp.exp(pt - mp_new)
        sp_new = beta * sp_ref[...] + jnp.sum(e_p, axis=-1, keepdims=True)
        num_new = beta * num_ref[...] + jnp.sum(
            e_p * (pt - qt), axis=-1, keepdims=True)
        mp_ref[...] = mp_new
        sp_ref[...] = sp_new
        num_ref[...] = num_new

        # --- finalize this row block on the last vocab tile -----------------
        @pl.when(j == nj - 1)
        def _():
            lse_q = m_new + jnp.log(sq_new)
            lse_qt = m_new * inv_temp + jnp.log(sqt_new)
            lse_pt = mp_new + jnp.log(sp_new)
            ce_rows = lse_q - pick_new                     # (tm, 1)
            kl_rows = num_new / sp_new + lse_qt - lse_pt   # exact divide

            ce_valid = (labels != -100).astype(jnp.float32)
            ce_sum = jnp.sum(ce_rows * ce_valid)
            n_valid = jnp.sum(ce_valid)
            kl_sum = jnp.sum(kl_rows * msk_ref[...])

            ce_ref[...] = jnp.zeros_like(ce_ref) + ce_sum
            cnt_ref[...] = jnp.zeros_like(cnt_ref) + n_valid
            kl_ref[...] = jnp.zeros_like(kl_ref) + kl_sum


def fused_tuned_head_and_losses(hidden_2d, w_t, full_2d, shift_labels, kl_mask,
                                *, kl_temperature, batch_size):
    M, H = hidden_2d.shape
    H2, V = w_t.shape
    assert H == H2 and full_2d.shape == (M, V)

    cfg = _select_config()
    tm = _pick_tile(M, cfg["tm"], aligns=(128, 8))   # rows (sublane side)
    tn = _pick_tile(V, cfg["tn"], aligns=(128,))     # vocab (lane-dense out)
    tk = _pick_tile(H, cfg["tk"], aligns=(128,))     # contraction
    gm, gv, gk = M // tm, V // tn, H // tk

    kernel = functools.partial(fused_head_loss_kernel,
                               inv_temp=1.0 / float(kl_temperature))
    part_shape = jax.ShapeDtypeStruct((gm, 8, 128), jnp.float32)
    part_spec = pl.BlockSpec((1, 8, 128), lambda i, j, k: (i, 0, 0))

    logits, ce_p, cnt_p, kl_p = pl.pallas_call(
        kernel,
        out_shape=(jax.ShapeDtypeStruct((M, V), hidden_2d.dtype),
                   part_shape, part_shape, part_shape),
        grid_spec=pltpu.PrefetchScalarGridSpec(
            num_scalar_prefetch=0,
            grid=(gm, gv, gk),
            in_specs=[
                pl.BlockSpec((tm, tk), lambda i, j, k: (i, k)),   # hidden
                pl.BlockSpec((tk, tn), lambda i, j, k: (k, j)),   # W^T (H, V)
                pl.BlockSpec((tm, tn), lambda i, j, k: (i, j)),   # frozen logits
                pl.BlockSpec((tm, 1), lambda i, j, k: (i, 0)),    # shift labels
                pl.BlockSpec((tm, 1), lambda i, j, k: (i, 0)),    # KL shift mask
            ],
            out_specs=(
                pl.BlockSpec((tm, tn), lambda i, j, k: (i, j)),   # target logits
                part_spec, part_spec, part_spec,
            ),
            scratch_shapes=[
                pltpu.VMEM((tm, tn), jnp.float32),   # f32 matmul accumulator
                pltpu.VMEM((tm, 1), jnp.float32),    # running max(q)
                pltpu.VMEM((tm, 1), jnp.float32),    # running sum exp(q - m)
                pltpu.VMEM((tm, 1), jnp.float32),    # running sum exp((q-m)/T)
                pltpu.VMEM((tm, 1), jnp.float32),    # running max(p/T)
                pltpu.VMEM((tm, 1), jnp.float32),    # running Z_p
                pltpu.VMEM((tm, 1), jnp.float32),    # running KL numerator
                pltpu.VMEM((tm, 1), jnp.float32),    # picked label logit
            ],
        ),
        compiler_params=pltpu.CompilerParams(
            dimension_semantics=("parallel", "arbitrary", "arbitrary"),
            vmem_limit_bytes=cfg["vmem"],
        ),
    )(hidden_2d, w_t, full_2d, shift_labels, kl_mask)

    ce_sum = jnp.sum(ce_p[:, 0, 0])
    n_valid = jnp.maximum(jnp.sum(cnt_p[:, 0, 0]), 1.0)
    kl_sum = jnp.sum(kl_p[:, 0, 0])
    return logits, ce_sum / n_valid, kl_sum / float(batch_size)


# ----------------------------------------------------------------------------
# Wrapper: mirrors LlamaWithTunedHead.forward (loss_type='combined')
# ----------------------------------------------------------------------------
def llama_with_tuned_head_forward(target_hidden, full_logits, labels, head_w,
                                  kl_temperature=2.0):
    """
    target_hidden: (B, S, H) bf16   == outputs.hidden_states[target_layer]
    full_logits:   (B, S, V) bf16   == outputs.logits of the frozen base model
    labels:        (B, S)    int32
    head_w:        (V, H)    bf16   == target_lm_head.weight (nn.Linear, no bias)
    """
    B, S, H = target_hidden.shape
    V = head_w.shape[0]
    M = B * S

    hidden_2d = target_hidden.reshape(M, H)
    full_2d = full_logits.reshape(M, V)
    # one-time (V,H)->(H,V) transpose: guarantees the clean (tm,tk)x(tk,tn) MXU
    # path in-kernel; amortized over the M/tm re-streams of the weight.
    w_t = jnp.transpose(head_w)

    # shifted labels with ignore_index=-100 at the last position of each
    # sequence (replaces the reference's [:, :-1] / [:, 1:] slices) and the
    # matching 0/1 mask for the KL term — tiny (M, 1) arrays.
    shift_labels = jnp.concatenate(
        [labels[:, 1:].astype(jnp.int32),
         jnp.full((B, 1), -100, dtype=jnp.int32)], axis=1).reshape(M, 1)
    kl_mask = jnp.concatenate(
        [jnp.ones((B, S - 1), jnp.float32),
         jnp.zeros((B, 1), jnp.float32)], axis=1).reshape(M, 1)

    target_logits_2d, ce_loss, kl_loss = fused_tuned_head_and_losses(
        hidden_2d, w_t, full_2d, shift_labels, kl_mask,
        kl_temperature=kl_temperature, batch_size=B)

    loss = ce_loss + kl_loss  # loss_type == 'combined'
    return {
        "loss": loss,
        "target_logits": target_logits_2d.reshape(B, S, V),
        "full_logits": full_logits,
        "metrics": {"perplexity_loss": ce_loss, "kl_loss": kl_loss},
    }


if __name__ == "__main__":
    key = jax.random.PRNGKey(0)
    B, S, H, V = 2, 8, 32, 64   # small synthetic llama-ish shapes
    T = 2.0
    k1, k2, k3, k4 = jax.random.split(key, 4)

    # stand-ins for frozen base-model outputs (deterministic synthetic data)
    target_hidden = jax.random.normal(k1, (B, S, H), jnp.float32).astype(jnp.bfloat16)
    full_logits = jax.random.normal(k2, (B, S, V), jnp.float32).astype(jnp.bfloat16)
    labels = jax.random.randint(k3, (B, S), 0, V, jnp.int32)

    # trainable tuned lm_head weight, (out_features=V, in_features=H) like nn.Linear
    head_w = (jax.random.normal(k4, (V, H), jnp.float32)
              * (1.0 / jnp.sqrt(H))).astype(jnp.bfloat16)

    out = llama_with_tuned_head_forward(target_hidden, full_logits, labels, head_w,
                                        kl_temperature=T)
    out = jax.block_until_ready(out)

    # ---- pure-JAX reference: f32 loss math on f32-accumulated logits --------
    M = B * S
    logits_f32 = jnp.dot(target_hidden.reshape(M, H), head_w.T,
                         preferred_element_type=jnp.float32).reshape(B, S, V)
    sl = logits_f32[:, :-1, :]
    fl = full_logits[:, :-1, :].astype(jnp.float32)
    lab = labels[:, 1:]
    logp_tuned = jax.nn.log_softmax(sl, axis=-1)
    ce_ref = -jnp.mean(jnp.take_along_axis(logp_tuned, lab[..., None], axis=-1))
    log_q = jax.nn.log_softmax(sl / T, axis=-1)
    p_soft = jax.nn.softmax(fl / T, axis=-1)
    log_p = jax.nn.log_softmax(fl / T, axis=-1)
    kl_ref = jnp.sum(p_soft * (log_p - log_q)) / B

    assert out["target_logits"].shape == (B, S, V)
    assert out["target_logits"].dtype == jnp.bfloat16
    assert bool(jnp.isfinite(out["loss"]))
    assert jnp.allclose(out["target_logits"].astype(jnp.float32), logits_f32,
                        rtol=2e-2, atol=2e-2)
    assert jnp.allclose(out["metrics"]["perplexity_loss"], ce_ref,
                        rtol=1e-2, atol=1e-2)
    assert jnp.allclose(out["metrics"]["kl_loss"], kl_ref, rtol=1e-2, atol=1e-2)
    print("KERNEL_OK")
</pallas_src>

<mosaic_0001>
module attributes {stable_mosaic.version = 11 : i64} {
  func.func @fused_head_loss_kernel(%arg0: i32, %arg1: i32, %arg2: i32, %arg3: memref<16x32xbf16, #tpu.memory_space<vmem>>, %arg4: memref<32x64xbf16, #tpu.memory_space<vmem>>, %arg5: memref<16x64xbf16, #tpu.memory_space<vmem>>, %arg6: memref<16x1xi32, #tpu.memory_space<vmem>>, %arg7: memref<16x1xf32, #tpu.memory_space<vmem>>, %arg8: memref<16x64xbf16, #tpu.memory_space<vmem>>, %arg9: memref<1x8x128xf32, #tpu.memory_space<vmem>>, %arg10: memref<1x8x128xf32, #tpu.memory_space<vmem>>, %arg11: memref<1x8x128xf32, #tpu.memory_space<vmem>>, %arg12: memref<16x64xf32, #tpu.memory_space<vmem>>, %arg13: memref<16x1xf32, #tpu.memory_space<vmem>>, %arg14: memref<16x1xf32, #tpu.memory_space<vmem>>, %arg15: memref<16x1xf32, #tpu.memory_space<vmem>>, %arg16: memref<16x1xf32, #tpu.memory_space<vmem>>, %arg17: memref<16x1xf32, #tpu.memory_space<vmem>>, %arg18: memref<16x1xf32, #tpu.memory_space<vmem>>, %arg19: memref<16x1xf32, #tpu.memory_space<vmem>>) attributes {dimension_semantics = [#tpu.dimension_semantics<parallel>, #tpu.dimension_semantics<arbitrary>, #tpu.dimension_semantics<arbitrary>], iteration_bounds = array<i64: 1, 1, 1>, scalar_prefetch = 0 : i64, scratch_operands = 8 : i64, tpu.core_type = #tpu.core_type<tc>, window_params = [{transform_indices = @transform_0, window_bounds = array<i64: 16, 32>}, {transform_indices = @transform_1, window_bounds = array<i64: 32, 64>}, {transform_indices = @transform_2, window_bounds = array<i64: 16, 64>}, {transform_indices = @transform_3, window_bounds = array<i64: 16, 1>}, {transform_indices = @transform_4, window_bounds = array<i64: 16, 1>}, {transform_indices = @transform_5, window_bounds = array<i64: 16, 64>}, {transform_indices = @transform_6, window_bounds = array<i64: 1, 8, 128>}, {transform_indices = @transform_7, window_bounds = array<i64: 1, 8, 128>}, {transform_indices = @transform_8, window_bounds = array<i64: 1, 8, 128>}]} {
    %c0_i32 = arith.constant 0 : i32
    %0 = arith.cmpi eq, %arg1, %c0_i32 : i32
    %c0_i32_0 = arith.constant 0 : i32
    %1 = arith.cmpi eq, %arg2, %c0_i32_0 : i32
    %2 = arith.andi %0, %1 : i1
    %3 = arith.extui %2 : i1 to i32
    %c0_i32_1 = arith.constant 0 : i32
    %4 = arith.cmpi ne, %3, %c0_i32_1 : i32
    scf.if %4 {
      %cst_13 = arith.constant 0.000000e+00 : f32
      %17 = vector.broadcast %cst_13 : f32 to vector<16x1xf32>
      %cst_14 = arith.constant 1.000000e+30 : f32
      %18 = vector.broadcast %cst_14 : f32 to vector<16x1xf32>
      %19 = arith.subf %17, %18 : vector<16x1xf32>
      %c0_15 = arith.constant 0 : index
      %c0_16 = arith.constant 0 : index
      %20 = vector.load %arg13[%c0_15, %c0_16] : memref<16x1xf32, #tpu.memory_space<vmem>>, vector<16x1xf32>
      tpu.vector_store %arg13[%c0_15, %c0_16], %19 {strides = array<i32>} : memref<16x1xf32, #tpu.memory_space<vmem>>, vector<16x1xf32>,
      %cst_17 = arith.constant 0.000000e+00 : f32
      %21 = vector.broadcast %cst_17 : f32 to vector<16x1xf32>
      %cst_18 = arith.constant 1.000000e+30 : f32
      %22 = vector.broadcast %cst_18 : f32 to vector<16x1xf32>
      %23 = arith.subf %21, %22 : vector<16x1xf32>
      %c0_19 = arith.constant 0 : index
      %c0_20 = arith.constant 0 : index
      %24 = vector.load %arg16[%c0_19, %c0_20] : memref<16x1xf32, #tpu.memory_space<vmem>>, vector<16x1xf32>
      tpu.vector_store %arg16[%c0_19, %c0_20], %23 {strides = array<i32>} : memref<16x1xf32, #tpu.memory_space<vmem>>, vector<16x1xf32>,
      %cst_21 = arith.constant 0.000000e+00 : f32
      %25 = vector.broadcast %cst_21 : f32 to vector<16x1xf32>
      %c0_22 = arith.constant 0 : index
      %c0_23 = arith.constant 0 : index
      %26 = vector.load %arg14[%c0_22, %c0_23] : memref<16x1xf32, #tpu.memory_space<vmem>>, vector<16x1xf32>
      tpu.vector_store %arg14[%c0_22, %c0_23], %25 {strides = array<i32>} : memref<16x1xf32, #tpu.memory_space<vmem>>, vector<16x1xf32>,
      %cst_24 = arith.constant 0.000000e+00 : f32
      %27 = vector.broadcast %cst_24 : f32 to vector<16x1xf32>
      %c0_25 = arith.constant 0 : index
      %c0_26 = arith.constant 0 : index
      %28 = vector.load %arg15[%c0_25, %c0_26] : memref<16x1xf32, #tpu.memory_space<vmem>>, vector<16x1xf32>
      tpu.vector_store %arg15[%c0_25, %c0_26], %27 {strides = array<i32>} : memref<16x1xf32, #tpu.memory_space<vmem>>, vector<16x1xf32>,
      %cst_27 = arith.constant 0.000000e+00 : f32
      %29 = vector.broadcast %cst_27 : f32 to vector<16x1xf32>
      %c0_28 = arith.constant 0 : index
      %c0_29 = arith.constant 0 : index
      %30 = vector.load %arg17[%c0_28, %c0_29] : memref<16x1xf32, #tpu.memory_space<vmem>>, vector<16x1xf32>
      tpu.vector_store %arg17[%c0_28, %c0_29], %29 {strides = array<i32>} : memref<16x1xf32, #tpu.memory_space<vmem>>, vector<16x1xf32>,
      %cst_30 = arith.constant 0.000000e+00 : f32
      %31 = vector.broadcast %cst_30 : f32 to vector<16x1xf32>
      %c0_31 = arith.constant 0 : index
      %c0_32 = arith.constant 0 : index
      %32 = vector.load %arg18[%c0_31, %c0_32] : memref<16x1xf32, #tpu.memory_space<vmem>>, vector<16x1xf32>
      tpu.vector_store %arg18[%c0_31, %c0_32], %31 {strides = array<i32>} : memref<16x1xf32, #tpu.memory_space<vmem>>, vector<16x1xf32>,
      %cst_33 = arith.constant 0.000000e+00 : f32
      %33 = vector.broadcast %cst_33 : f32 to vector<16x1xf32>
      %c0_34 = arith.constant 0 : index
      %c0_35 = arith.constant 0 : index
      %34 = vector.load %arg19[%c0_34, %c0_35] : memref<16x1xf32, #tpu.memory_space<vmem>>, vector<16x1xf32>
      tpu.vector_store %arg19[%c0_34, %c0_35], %33 {strides = array<i32>} : memref<16x1xf32, #tpu.memory_space<vmem>>, vector<16x1xf32>,
    } else {
    }
    %c0_i32_2 = arith.constant 0 : i32
    %5 = arith.cmpi eq, %arg2, %c0_i32_2 : i32
    %6 = arith.extui %5 : i1 to i32
    %c0_i32_3 = arith.constant 0 : i32
    %7 = arith.cmpi ne, %6, %c0_i32_3 : i32
    scf.if %7 {
      %cst_13 = arith.constant 0.000000e+00 : f32
      %17 = vector.broadcast %cst_13 : f32 to vector<16x64xf32>
      %c0_14 = arith.constant 0 : index
      %c0_15 = arith.constant 0 : index
      %18 = vector.load %arg12[%c0_14, %c0_15] : memref<16x64xf32, #tpu.memory_space<vmem>>, vector<16x64xf32>
      tpu.vector_store %arg12[%c0_14, %c0_15], %17 {strides = array<i32>} : memref<16x64xf32, #tpu.memory_space<vmem>>, vector<16x64xf32>,
    } else {
    }
    %c0 = arith.constant 0 : index
    %c0_4 = arith.constant 0 : index
    %8 = vector.load %arg12[%c0, %c0_4] : memref<16x64xf32, #tpu.memory_space<vmem>>, vector<16x64xf32>
    %c0_5 = arith.constant 0 : index
    %c0_6 = arith.constant 0 : index
    %9 = vector.load %arg3[%c0_5, %c0_6] : memref<16x32xbf16, #tpu.memory_space<vmem>>, vector<16x32xbf16>
    %c0_7 = arith.constant 0 : index
    %c0_8 = arith.constant 0 : index
    %10 = vector.load %arg4[%c0_7, %c0_8] : memref<32x64xbf16, #tpu.memory_space<vmem>>, vector<32x64xbf16>
    %cst = arith.constant dense<0.000000e+00> : vector<16x64xf32>
    %11 = tpu.matmul %9, %10, %cst {dimension_numbers = #tpu.dot_dimension_numbers<[1], [0], [0], [1], [0, 0, 1, 1], [], []>} : vector<16x32xbf16>, vector<32x64xbf16>, vector<16x64xf32> -> vector<16x64xf32>
    %12 = arith.addf %8, %11 : vector<16x64xf32>
    %c0_9 = arith.constant 0 : index
    %c0_10 = arith.constant 0 : index
    %13 = vector.load %arg12[%c0_9, %c0_10] : memref<16x64xf32, #tpu.memory_space<vmem>>, vector<16x64xf32>
    tpu.vector_store %arg12[%c0_9, %c0_10], %12 {strides = array<i32>} : memref<16x64xf32, #tpu.memory_space<vmem>>, vector<16x64xf32>,
    %c0_i32_11 = arith.constant 0 : i32
    %14 = arith.cmpi eq, %arg2, %c0_i32_11 : i32
    %15 = arith.extui %14 : i1 to i32
    %c0_i32_12 = arith.constant 0 : i32
    %16 = arith.cmpi ne, %15, %c0_i32_12 : i32
    scf.if %16 {
      %c0_13 = arith.constant 0 : index
      %c0_14 = arith.constant 0 : index
      %17 = vector.load %arg12[%c0_13, %c0_14] : memref<16x64xf32, #tpu.memory_space<vmem>>, vector<16x64xf32>
      %18 = arith.truncf %17 : vector<16x64xf32> to vector<16x64xbf16>
      %c0_15 = arith.constant 0 : index
      %c0_16 = arith.constant 0 : index
      %19 = vector.load %arg8[%c0_15, %c0_16] : memref<16x64xbf16, #tpu.memory_space<vmem>>, vector<16x64xbf16>
      tpu.vector_store %arg8[%c0_15, %c0_16], %18 {strides = array<i32>} : memref<16x64xbf16, #tpu.memory_space<vmem>>, vector<16x64xbf16>,
      %c0_17 = arith.constant 0 : index
      %c0_18 = arith.constant 0 : index
      %20 = vector.load %arg5[%c0_17, %c0_18] : memref<16x64xbf16, #tpu.memory_space<vmem>>, vector<16x64xbf16>
      %21 = arith.extf %20 : vector<16x64xbf16> to vector<16x64xf32>
      %c0_19 = arith.constant 0 : index
      %c0_20 = arith.constant 0 : index
      %22 = vector.load %arg6[%c0_19, %c0_20] : memref<16x1xi32, #tpu.memory_space<vmem>>, vector<16x1xi32>
      %c0_21 = arith.constant 0 : index
      %c0_22 = arith.constant 0 : index
      %23 = vector.load %arg13[%c0_21, %c0_22] : memref<16x1xf32, #tpu.memory_space<vmem>>, vector<16x1xf32>
      %cst_23 = arith.constant dense<0xFF800000> : vector<16xf32>
      %24 = vector.multi_reduction <maximumf>, %17, %cst_23 [1] : vector<16x64xf32> to vector<16xf32>
      %25 = vector.shape_cast %24 : vector<16xf32> to vector<16x1xf32>
      %26 = arith.maximumf %23, %25 : vector<16x1xf32>
      %27 = arith.subf %23, %26 : vector<16x1xf32>
      %28 = math.exp %27 : vector<16x1xf32>
      %29 = arith.subf %23, %26 : vector<16x1xf32>
      %cst_24 = arith.constant 5.000000e-01 : f32
      %30 = vector.broadcast %cst_24 : f32 to vector<16x1xf32>
      %31 = arith.mulf %29, %30 : vector<16x1xf32>
      %32 = math.exp %31 : vector<16x1xf32>
      %c0_25 = arith.constant 0 : index
      %c0_26 = arith.constant 0 : index
      %33 = vector.load %arg14[%c0_25, %c0_26] : memref<16x1xf32, #tpu.memory_space<vmem>>, vector<16x1xf32>
      %34 = arith.mulf %28, %33 : vector<16x1xf32>
      %35 = vector.broadcast %26 : vector<16x1xf32> to vector<16x64xf32>
      %36 = arith.subf %17, %35 : vector<16x64xf32>
      %37 = math.exp %36 : vector<16x64xf32>
      %cst_27 = arith.constant dense<0.000000e+00> : vector<16xf32>
      %38 = vector.multi_reduction <add>, %37, %cst_27 [1] : vector<16x64xf32> to vector<16xf32>
      %39 = vector.shape_cast %38 : vector<16xf32> to vector<16x1xf32>
      %40 = arith.addf %34, %39 : vector<16x1xf32>
      %c0_28 = arith.constant 0 : index
      %c0_29 = arith.constant 0 : index
      %41 = vector.load %arg15[%c0_28, %c0_29] : memref<16x1xf32, #tpu.memory_space<vmem>>, vector<16x1xf32>
      %42 = arith.mulf %32, %41 : vector<16x1xf32>
      %43 = vector.broadcast %26 : vector<16x1xf32> to vector<16x64xf32>
      %44 = arith.subf %17, %43 : vector<16x64xf32>
      %cst_30 = arith.constant 5.000000e-01 : f32
      %45 = vector.broadcast %cst_30 : f32 to vector<16x64xf32>
      %46 = arith.mulf %44, %45 : vector<16x64xf32>
      %47 = math.exp %46 : vector<16x64xf32>
      %cst_31 = arith.constant dense<0.000000e+00> : vector<16xf32>
      %48 = vector.multi_reduction <add>, %47, %cst_31 [1] : vector<16x64xf32> to vector<16xf32>
      %49 = vector.shape_cast %48 : vector<16xf32> to vector<16x1xf32>
      %50 = arith.addf %42, %49 : vector<16x1xf32>
      %c64_i32 = arith.constant 64 : i32
      %51 = arith.muli %arg1, %c64_i32 : i32
      %52 = tpu.iota {dimensions = array<i32: 1>} : vector<16x64xi32>
      %53 = vector.broadcast %51 : i32 to vector<16x64xi32>
      %54 = arith.addi %53, %52 : vector<16x64xi32>
      %c0_32 = arith.constant 0 : index
      %c0_33 = arith.constant 0 : index
      %55 = vector.load %arg19[%c0_32, %c0_33] : memref<16x1xf32, #tpu.memory_space<vmem>>, vector<16x1xf32>
      %56 = vector.broadcast %22 : vector<16x1xi32> to vector<16x64xi32>
      %57 = arith.cmpi eq, %54, %56 : vector<16x64xi32>
      %cst_34 = arith.constant 0.000000e+00 : f32
      %58 = vector.broadcast %cst_34 : f32 to vector<16x64xf32>
      %59 = arith.select %57, %17, %58 : vector<16x64xi1>, vector<16x64xf32>
      %cst_35 = arith.constant dense<0.000000e+00> : vector<16xf32>
      %60 = vector.multi_reduction <add>, %59, %cst_35 [1] : vector<16x64xf32> to vector<16xf32>
      %61 = vector.shape_cast %60 : vector<16xf32> to vector<16x1xf32>
      %62 = arith.addf %55, %61 : vector<16x1xf32>
      %c0_36 = arith.constant 0 : index
      %c0_37 = arith.constant 0 : index
      %63 = vector.load %arg13[%c0_36, %c0_37] : memref<16x1xf32, #tpu.memory_space<vmem>>, vector<16x1xf32>
      tpu.vector_store %arg13[%c0_36, %c0_37], %26 {strides = array<i32>} : memref<16x1xf32, #tpu.memory_space<vmem>>, vector<16x1xf32>,
      %c0_38 = arith.constant 0 : index
      %c0_39 = arith.constant 0 : index
      %64 = vector.load %arg14[%c0_38, %c0_39] : memref<16x1xf32, #tpu.memory_space<vmem>>, vector<16x1xf32>
      tpu.vector_store %arg14[%c0_38, %c0_39], %40 {strides = array<i32>} : memref<16x1xf32, #tpu.memory_space<vmem>>, vector<16x1xf32>,
      %c0_40 = arith.constant 0 : index
      %c0_41 = arith.constant 0 : index
      %65 = vector.load %arg15[%c0_40, %c0_41] : memref<16x1xf32, #tpu.memory_space<vmem>>, vector<16x1xf32>
      tpu.vector_store %arg15[%c0_40, %c0_41], %50 {strides = array<i32>} : memref<16x1xf32, #tpu.memory_space<vmem>>, vector<16x1xf32>,
      %c0_42 = arith.constant 0 : index
      %c0_43 = arith.constant 0 : index
      %66 = vector.load %arg19[%c0_42, %c0_43] : memref<16x1xf32, #tpu.memory_space<vmem>>, vector<16x1xf32>
      tpu.vector_store %arg19[%c0_42, %c0_43], %62 {strides = array<i32>} : memref<16x1xf32, #tpu.memory_space<vmem>>, vector<16x1xf32>,
      %cst_44 = arith.constant 5.000000e-01 : f32
      %67 = vector.broadcast %cst_44 : f32 to vector<16x64xf32>
      %68 = arith.mulf %21, %67 : vector<16x64xf32>
      %cst_45 = arith.constant 5.000000e-01 : f32
      %69 = vector.broadcast %cst_45 : f32 to vector<16x64xf32>
      %70 = arith.mulf %17, %69 : vector<16x64xf32>
      %c0_46 = arith.constant 0 : index
      %c0_47 = arith.constant 0 : index
      %71 = vector.load %arg16[%c0_46, %c0_47] : memref<16x1xf32, #tpu.memory_space<vmem>>, vector<16x1xf32>
      %cst_48 = arith.constant dense<0xFF800000> : vector<16xf32>
      %72 = vector.multi_reduction <maximumf>, %68, %cst_48 [1] : vector<16x64xf32> to vector<16xf32>
      %73 = vector.shape_cast %72 : vector<16xf32> to vector<16x1xf32>
      %74 = arith.maximumf %71, %73 : vector<16x1xf32>
      %75 = arith.subf %71, %74 : vector<16x1xf32>
      %76 = math.exp %75 : vector<16x1xf32>
      %77 = vector.broadcast %74 : vector<16x1xf32> to vector<16x64xf32>
      %78 = arith.subf %68, %77 : vector<16x64xf32>
      %79 = math.exp %78 : vector<16x64xf32>
      %c0_49 = arith.constant 0 : index
      %c0_50 = arith.constant 0 : index
      %80 = vector.load %arg17[%c0_49, %c0_50] : memref<16x1xf32, #tpu.memory_space<vmem>>, vector<16x1xf32>
      %81 = arith.mulf %76, %80 : vector<16x1xf32>
      %cst_51 = arith.constant dense<0.000000e+00> : vector<16xf32>
      %82 = vector.multi_reduction <add>, %79, %cst_51 [1] : vector<16x64xf32> to vector<16xf32>
      %83 = vector.shape_cast %82 : vector<16xf32> to vector<16x1xf32>
      %84 = arith.addf %81, %83 : vector<16x1xf32>
      %c0_52 = arith.constant 0 : index
      %c0_53 = arith.constant 0 : index
      %85 = vector.load %arg18[%c0_52, %c0_53] : memref<16x1xf32, #tpu.memory_space<vmem>>, vector<16x1xf32>
      %86 = arith.mulf %76, %85 : vector<16x1xf32>
      %87 = arith.subf %68, %70 : vector<16x64xf32>
      %88 = arith.mulf %79, %87 : vector<16x64xf32>
      %cst_54 = arith.constant dense<0.000000e+00> : vector<16xf32>
      %89 = vector.multi_reduction <add>, %88, %cst_54 [1] : vector<16x64xf32> to vector<16xf32>
      %90 = vector.shape_cast %89 : vector<16xf32> to vector<16x1xf32>
      %91 = arith.addf %86, %90 : vector<16x1xf32>
      %c0_55 = arith.constant 0 : index
      %c0_56 = arith.constant 0 : index
      %92 = vector.load %arg16[%c0_55, %c0_56] : memref<16x1xf32, #tpu.memory_space<vmem>>, vector<16x1xf32>
      tpu.vector_store %arg16[%c0_55, %c0_56], %74 {strides = array<i32>} : memref<16x1xf32, #tpu.memory_space<vmem>>, vector<16x1xf32>,
      %c0_57 = arith.constant 0 : index
      %c0_58 = arith.constant 0 : index
      %93 = vector.load %arg17[%c0_57, %c0_58] : memref<16x1xf32, #tpu.memory_space<vmem>>, vector<16x1xf32>
      tpu.vector_store %arg17[%c0_57, %c0_58], %84 {strides = array<i32>} : memref<16x1xf32, #tpu.memory_space<vmem>>, vector<16x1xf32>,
      %c0_59 = arith.constant 0 : index
      %c0_60 = arith.constant 0 : index
      %94 = vector.load %arg18[%c0_59, %c0_60] : memref<16x1xf32, #tpu.memory_space<vmem>>, vector<16x1xf32>
      tpu.vector_store %arg18[%c0_59, %c0_60], %91 {strides = array<i32>} : memref<16x1xf32, #tpu.memory_space<vmem>>, vector<16x1xf32>,
      %c0_i32_61 = arith.constant 0 : i32
      %95 = arith.cmpi eq, %arg1, %c0_i32_61 : i32
      %96 = arith.extui %95 : i1 to i32
      %c0_i32_62 = arith.constant 0 : i32
      %97 = arith.cmpi ne, %96, %c0_i32_62 : i32
      scf.if %97 {
        %98 = math.log %40 : vector<16x1xf32>
        %99 = arith.addf %26, %98 : vector<16x1xf32>
        %cst_63 = arith.constant 5.000000e-01 : f32
        %100 = vector.broadcast %cst_63 : f32 to vector<16x1xf32>
        %101 = arith.mulf %26, %100 : vector<16x1xf32>
        %102 = math.log %50 : vector<16x1xf32>
        %103 = arith.addf %101, %102 : vector<16x1xf32>
        %104 = math.log %84 : vector<16x1xf32>
        %105 = arith.addf %74, %104 : vector<16x1xf32>
        %106 = arith.subf %99, %62 : vector<16x1xf32>
        %107 = arith.divf %91, %84 : vector<16x1xf32>
        %108 = arith.addf %107, %103 : vector<16x1xf32>
        %109 = arith.subf %108, %105 : vector<16x1xf32>
        %c-100_i32 = arith.constant -100 : i32
        %110 = vector.broadcast %c-100_i32 : i32 to vector<16x1xi32>
        %111 = arith.cmpi ne, %22, %110 : vector<16x1xi32>
        %112 = arith.extui %111 : vector<16x1xi1> to vector<16x1xi32>
        %113 = arith.sitofp %112 : vector<16x1xi32> to vector<16x1xf32>
        %114 = arith.mulf %106, %113 : vector<16x1xf32>
        %115 = vector.shape_cast %114 : vector<16x1xf32> to vector<1x16x1xf32>
        %cst_64 = arith.constant dense<0.000000e+00> : vector<1xf32>
        %116 = vector.multi_reduction <add>, %115, %cst_64 [1, 2] : vector<1x16x1xf32> to vector<1xf32>
        %117 = vector.shape_cast %116 : vector<1xf32> to vector<1x1x1xf32>
        %118 = vector.extract %117[0, 0, 0] : f32 from vector<1x1x1xf32>
        %119 = vector.shape_cast %113 : vector<16x1xf32> to vector<1x16x1xf32>
        %cst_65 = arith.constant dense<0.000000e+00> : vector<1xf32>
        %120 = vector.multi_reduction <add>, %119, %cst_65 [1, 2] : vector<1x16x1xf32> to vector<1xf32>
        %121 = vector.shape_cast %120 : vector<1xf32> to vector<1x1x1xf32>
        %122 = vector.extract %121[0, 0, 0] : f32 from vector<1x1x1xf32>
        %c0_66 = arith.constant 0 : index
        %c0_67 = arith.constant 0 : index
        %123 = vector.load %arg7[%c0_66, %c0_67] : memref<16x1xf32, #tpu.memory_space<vmem>>, vector<16x1xf32>
        %124 = arith.mulf %109, %123 : vector<16x1xf32>
        %125 = vector.shape_cast %124 : vector<16x1xf32> to vector<1x16x1xf32>
        %cst_68 = arith.constant dense<0.000000e+00> : vector<1xf32>
        %126 = vector.multi_reduction <add>, %125, %cst_68 [1, 2] : vector<1x16x1xf32> to vector<1xf32>
        %127 = vector.shape_cast %126 : vector<1xf32> to vector<1x1x1xf32>
        %128 = vector.extract %127[0, 0, 0] : f32 from vector<1x1x1xf32>
        %cst_69 = arith.constant 0.000000e+00 : f32
        %129 = vector.broadcast %cst_69 : f32 to vector<1x8x128xf32>
        %130 = vector.broadcast %118 : f32 to vector<1x8x128xf32>
        %131 = arith.addf %129, %130 : vector<1x8x128xf32>
        %c0_70 = arith.constant 0 : index
        %c0_71 = arith.constant 0 : index
        %c0_72 = arith.constant 0 : index
        %132 = vector.load %arg9[%c0_70, %c0_71, %c0_72] : memref<1x8x128xf32, #tpu.memory_space<vmem>>, vector<1x8x128xf32>
        tpu.vector_store %arg9[%c0_70, %c0_71, %c0_72], %131 {strides = array<i32>} : memref<1x8x128xf32, #tpu.memory_space<vmem>>, vector<1x8x128xf32>,
        %cst_73 = arith.constant 0.000000e+00 : f32
        %133 = vector.broadcast %cst_73 : f32 to vector<1x8x128xf32>
        %134 = vector.broadcast %122 : f32 to vector<1x8x128xf32>
        %135 = arith.addf %133, %134 : vector<1x8x128xf32>
        %c0_74 = arith.constant 0 : index
        %c0_75 = arith.constant 0 : index
        %c0_76 = arith.constant 0 : index
        %136 = vector.load %arg10[%c0_74, %c0_75, %c0_76] : memref<1x8x128xf32, #tpu.memory_space<vmem>>, vector<1x8x128xf32>
        tpu.vector_store %arg10[%c0_74, %c0_75, %c0_76], %135 {strides = array<i32>} : memref<1x8x128xf32, #tpu.memory_space<vmem>>, vector<1x8x128xf32>,
        %cst_77 = arith.constant 0.000000e+00 : f32
        %137 = vector.broadcast %cst_77 : f32 to vector<1x8x128xf32>
        %138 = vector.broadcast %128 : f32 to vector<1x8x128xf32>
        %139 = arith.addf %137, %138 : vector<1x8x128xf32>
        %c0_78 = arith.constant 0 : index
        %c0_79 = arith.constant 0 : index
        %c0_80 = arith.constant 0 : index
        %140 = vector.load %arg11[%c0_78, %c0_79, %c0_80] : memref<1x8x128xf32, #tpu.memory_space<vmem>>, vector<1x8x128xf32>
        tpu.vector_store %arg11[%c0_78, %c0_79, %c0_80], %139 {strides = array<i32>} : memref<1x8x128xf32, #tpu.memory_space<vmem>>, vector<1x8x128xf32>,
      } else {
      }
    } else {
    }
    return
  }
  func.func @transform_0(%arg0: i32, %arg1: i32, %arg2: i32) -> (i32, i32) {
    %c0_i32 = arith.constant 0 : i32
    return %arg0, %arg2 : i32, i32
  }
  func.func @transform_1(%arg0: i32, %arg1: i32, %arg2: i32) -> (i32, i32) {
    %c0_i32 = arith.constant 0 : i32
    return %arg2, %arg1 : i32, i32
  }
  func.func @transform_2(%arg0: i32, %arg1: i32, %arg2: i32) -> (i32, i32) {
    %c0_i32 = arith.constant 0 : i32
    return %arg0, %arg1 : i32, i32
  }
  func.func @transform_3(%arg0: i32, %arg1: i32, %arg2: i32) -> (i32, i32) {
    %c0_i32 = arith.constant 0 : i32
    %c0_i32_0 = arith.constant 0 : i32
    return %arg0, %c0_i32 : i32, i32
  }
  func.func @transform_4(%arg0: i32, %arg1: i32, %arg2: i32) -> (i32, i32) {
    %c0_i32 = arith.constant 0 : i32
    %c0_i32_0 = arith.constant 0 : i32
    return %arg0, %c0_i32 : i32, i32
  }
  func.func @transform_5(%arg0: i32, %arg1: i32, %arg2: i32) -> (i32, i32) {
    %c0_i32 = arith.constant 0 : i32
    return %arg0, %arg1 : i32, i32
  }
  func.func @transform_6(%arg0: i32, %arg1: i32, %arg2: i32) -> (i32, i32, i32) {
    %c0_i32 = arith.constant 0 : i32
    %c0_i32_0 = arith.constant 0 : i32
    %c0_i32_1 = arith.constant 0 : i32
    return %arg0, %c0_i32, %c0_i32_0 : i32, i32, i32
  }
  func.func @transform_7(%arg0: i32, %arg1: i32, %arg2: i32) -> (i32, i32, i32) {
    %c0_i32 = arith.constant 0 : i32
    %c0_i32_0 = arith.constant 0 : i32
    %c0_i32_1 = arith.constant 0 : i32
    return %arg0, %c0_i32, %c0_i32_0 : i32, i32, i32
  }
  func.func @transform_8(%arg0: i32, %arg1: i32, %arg2: i32) -> (i32, i32, i32) {
    %c0_i32 = arith.constant 0 : i32
    %c0_i32_0 = arith.constant 0 : i32
    %c0_i32_1 = arith.constant 0 : i32
    return %arg0, %c0_i32, %c0_i32_0 : i32, i32, i32
  }
}

</mosaic_0001>

<bundles_post_ra>
// kernel: tpu_custom_call.1
= control target key start
LH: loop header
LB: loop body
LE: loop exit
PB: predicated region body
PF: predicated region fallthrough
CT: control target
= control target key end

     0   :  { %14 = vsyncpa [#allocation11], 0  ;;  %s887_s0 = inlined_call_operand.vmem [shape: bf16[16,32], index: 0, kind: input, shape index: {}]   ;;  %s888_s1 = inlined_call_operand.vmem [shape: bf16[32,64], index: 1, kind: input, shape index: {}]   ;;  %s889_s2 = inlined_call_operand.vmem [shape: bf16[16,64], index: 2, kind: input, shape index: {}]   ;;  %s890_s3 = inlined_call_operand.vmem [shape: s32[16,1], index: 3, kind: input, shape index: {}]   ;;  %s891_s4 = inlined_call_operand.vmem [shape: f32[16,1], index: 4, kind: input, shape index: {}]   ;;  %s892_s5 = inlined_call_operand.hbm [shape: bf16[16,64], index: 5, kind: output, shape index: {0}]   ;;  %s893_s6 = inlined_call_operand.hbm [shape: f32[1,8,128], index: 6, kind: output, shape index: {1}]   ;;  %s894_s7 = inlined_call_operand.hbm [shape: f32[1,8,128], index: 7, kind: output, shape index: {2}]   ;;  %s895_s8 = inlined_call_operand.hbm [shape: f32[1,8,128], index: 8, kind: output, shape index: {3}]  }
   0x1   :  { %15 = vsyncpa [#allocation13], 0  ;;  %v514_v0 = vld [vmem:[%s888_s1 + $0x8] sm:$0xff]   ;;  %v643_v1 = vmov 0.0   ;;  %vm52_vm0 = vcmask 523264   ;;  %v482_v2 = vld [vmem:[%s889_s2] sm:$0xff]  }
   0x2   :  { %488 = vmatprep.subr.bf16.mxu0 %v643_v1  ;;  %v483_v3 = vunpack.c.l.bf16 %v482_v2  ;;  %53 = vst.msk [vmem:[#allocation2] sm:$0xff] %vm52_vm0, %v643_v1  ;;  %54 = vst.msk [vmem:[#allocation2 + $0x8] sm:$0xff] %vm52_vm0, %v643_v1  ;;  %v515_v4 = vld [vmem:[%s888_s1] sm:$0xff]   ;;  %v484_v5 = vunpack.c.h.bf16 %v482_v2  ;;  %vm644_vm1 = vmmov 0  }
   0x3   :  { %489 = vmatpush3.bf16.msra.mxu0 %v514_v0  ;;  %492 = vmatprep.mubr.msk.bf16.mxu0 %vm644_vm1, %v643_v1 }
   0x4   :  { %490 = vmatprep.subr.bf16.mxu0 %v643_v1 }
   0x5   :  { %16 = vsyncpa [#allocation16], 0  ;;  %v714_v6 = vmul.f32 0.5, %v483_v3  ;;  %v716_v7 = vmul.f32 0.5, %v484_v5  ;;  %v516_v8 = vld [vmem:[%s887_s0] sm:$0xff]   ;;  %vm80_vm2 = vcmask 261120   ;;  %v221_v61 = vlaneseq }
   0x6   :  { %vm34_vm3 = vcmask 7168   ;;  %v645_v11 = vmov -1e+30   ;;  %v646_v12 = vmov 0   ;;  %vm143_vm4 = vcmask 519168   ;;  %v798_v39 = vld [vmem:[%s890_s3] sm:$0xff] }
   0x7   :  { %v260_v9 = vsel %vm52_vm0, %v714_v6, -inf  ;;  %491 = vmatpush3.bf16.msra.mxu0 %v515_v4  ;;  %v263_v10 = vsel %vm52_vm0, %v716_v7, -inf  ;;  %37 = vst.msk [vmem:[#allocation6] sm:$0xff] %vm34_vm3, %v645_v11  ;;  %35 = vst.msk [vmem:[#allocation3] sm:$0xff] %vm34_vm3, %v645_v11  ;;  %513 = vset.pattern.permute.xlu1 %v646_v12  ;;  %v804_v40 = vld [vmem:[%s890_s3 + $0x8] sm:$0xff]  ;;  %vm357_vm7 = vcmp.ne.s32.totalorder %v798_v39, 4294967196 }
   0x8   :  { %261 = vmax.xlane.f32.xlu1 %v260_v9  ;;  %36 = vst.msk [vmem:[#allocation3 + $0x8] sm:$0xff] %vm34_vm3, %v645_v11  ;;  %38 = vst.msk [vmem:[#allocation6 + $0x8] sm:$0xff] %vm34_vm3, %v645_v11  ;;  %512 = vset.pattern.permute.xlu0 %v646_v12  ;;  %vm358_vm8 = vcmp.ne.s32.totalorder %v804_v40, 4294967196  ;;  %s647_s17 = smov [#allocation10]  }
   0x9   :  { %39 = vst.msk [vmem:[#allocation4] sm:$0xff] %vm34_vm3, %v643_v1  ;;  %40 = vst.msk [vmem:[#allocation4 + $0x8] sm:$0xff] %vm34_vm3, %v643_v1  ;;  %v55_v19 = vld [vmem:[#allocation2] sm:$0xff]  ;;  %v56_v23 = vld [vmem:[#allocation2 + $0x8] sm:$0xff]  ;;  %s419_s18 = sshll.u32 %s647_s17, 4  ;;  %s420_s18 = int_to_ptr.vmem [resolvable:$true] %s419_s18 }
   0xa   :  { %493 = vmatmul.mubr.msk.bf16.vlgmr.msra.gmra.mxu0 %vm80_vm2, %v516_v8  ;;  %41 = vst.msk [vmem:[#allocation5] sm:$0xff] %vm34_vm3, %v643_v1  ;;  %42 = vst.msk [vmem:[#allocation5 + $0x8] sm:$0xff] %vm34_vm3, %v643_v1  ;;  %v222_v8 = vand.u32 127, %v221_v61  ;;  %s557_s19 = scalar_lea.vmem %s420_s18, 128  ;;  %p562_p1 = scmp.lt.s32.totalorder %s420_s18, %s420_s18 }
   0xb   :  { %43 = vst.msk [vmem:[#allocation7] sm:$0xff] %vm34_vm3, %v643_v1  ;;  %44 = vst.msk [vmem:[#allocation7 + $0x8] sm:$0xff] %vm34_vm3, %v643_v1  ;;  %p558_p0 = scmp.ne.s32.totalorder %s420_s18, %s557_s19  ;;  %p563_p2 = scmp.lt.s32.totalorder %s557_s19, %s557_s19 }
   0xc   :  { %45 = vst.msk [vmem:[#allocation8] sm:$0xff] %vm34_vm3, %v643_v1  ;;  %46 = vst.msk [vmem:[#allocation8 + $0x8] sm:$0xff] %vm34_vm3, %v643_v1  ;;  %264 = vmax.xlane.f32.xlu1 %v263_v10 }
   0xd   :  { %47 = vst.msk [vmem:[#allocation9] sm:$0xff] %vm34_vm3, %v643_v1  ;;  %48 = vst.msk [vmem:[#allocation9 + $0x8] sm:$0xff] %vm34_vm3, %v643_v1  ;;  %p564_p3 = por %p563_p2, %p562_p1 }
   0xe   :  { %v749_v13 = vld [vmem:[#allocation6] sm:$0xff]  ;;  %v778_v33 = vld [vmem:[#allocation3] sm:$0xff] }
   0xf   :  { %v754_v16 = vld [vmem:[#allocation6 + $0x8] sm:$0xff]  ;;  %v783_v36 = vld [vmem:[#allocation3 + $0x8] sm:$0xff]  ;;  %p565_p4 = pnand %p564_p3, %p558_p0 }
  0x91   :  { %v262_v14 = vpop.xlane.xlu1 %261 }
  0x92   :  { %v752_v15 = vmax.f32 %v749_v13, %v262_v14 }
  0x94   :  { %318 = vst.msk [vmem:[#allocation6] sm:$0xff] %vm34_vm3, %v752_v15  ;;  %276 = vperm.xlu1 %513, %v752_v15  }
  0x95   :  { %v265_v17 = vpop.xlane.xlu1 %264 }
  0x96   :  { %v760_v18 = vmax.f32 %v754_v16, %v265_v17 }
  0x98   :  { %319 = vst.msk [vmem:[#allocation6 + $0x8] sm:$0xff] %vm34_vm3, %v760_v18 }
  0xca   :  { %v118_v20 = vpop.f32.mrf.mxu0 }
  0xcb   :  { %v125_v21 = vadd.f32 %v118_v20, %v55_v19 }
  0xcc   :  { %v494_v22 = vpop.f32.mrf.mxu0 }
  0xcd   :  { %128 = vst.msk [vmem:[#allocation2] sm:$0xff] %vm52_vm0, %v125_v21 }
  0xce   :  { %v121_v24 = vpop.f32.mrf.mxu0 }
  0xcf   :  { %v126_v25 = vadd.f32 %v121_v24, %v56_v23 }
  0xd0   :  { %v495_v26 = vpop.f32.mrf.mxu0 }
  0xd1   :  { %129 = vst.msk [vmem:[#allocation2 + $0x8] sm:$0xff] %vm52_vm0, %v126_v25  ;;  %v830_v26 = vsel %vm357_vm7, 1.0, %v643_v1 }
  0xd4   :  { %v766_v27 = vld [vmem:[#allocation2] sm:$0xff] }
  0xd5   :  { %v154_v28 = vsel %vm52_vm0, %v766_v27, -inf  ;;  %v479_v29 = vpack.c.bf16 %v766_v27, %v766_v27  ;;  %v256_v63 = vmul.f32 0.5, %v766_v27 }
  0xd6   :  { %155 = vmax.xlane.f32.xlu0 %v154_v28  ;;  %v377_v28 = vsel %vm34_vm3, %v830_v26, 0.0 }
  0xd7   :  { %144 = vst.msk [vmem:[#allocation10] sm:$0xf] %vm143_vm4, %v479_v29  ;;  %v306_v10 = vsub.f32 %v714_v6, %v256_v63 }
  0xd8   :  { %v772_v30 = vld [vmem:[#allocation2 + $0x8] sm:$0xff] }
  0xd9   :  { %v157_v31 = vsel %vm52_vm0, %v772_v30, -inf  ;;  %v480_v32 = vpack.c.bf16 %v772_v30, %v772_v30  ;;  %v257_v4 = vmul.f32 0.5, %v772_v30 }
  0xda   :  { %158 = vmax.xlane.f32.xlu0 %v157_v31 }
  0xdb   :  { %145 = vst.msk [vmem:[#allocation10 + $0x4] sm:$0xf] %vm143_vm4, %v480_v32  ;;  %v307_v17 = vsub.f32 %v716_v7, %v257_v4 }
 0x10f   :  { %v277_v41 = vpop.permute.xlu1 %276 }
 0x110   :  { %v284_v47 = vsub.f32 %v714_v6, %v277_v41 }
 0x112   :  { %v286_v53 = vmul.f32 1.442695, %v284_v47 }
 0x15f   :  { %v156_v34 = vpop.xlane.xlu0 %155 }
 0x160   :  { %v781_v35 = vmax.f32 %v778_v33, %v156_v34 }
 0x162   :  { %246 = vst.msk [vmem:[#allocation3] sm:$0xff] %vm34_vm3, %v781_v35  ;;  %180 = vperm.xlu0 %512, %v781_v35   ;;  %v162_v31 = vsub.f32 %v778_v33, %v781_v35 }
 0x163   :  { %v159_v37 = vpop.xlane.xlu0 %158 }
 0x164   :  { %v789_v38 = vmax.f32 %v783_v36, %v159_v37  ;;  %v164_v34 = vmul.f32 1.442695, %v162_v31  ;;  %v168_v37 = vmul.f32 0.5, %v162_v31 }
 0x166   :  { %247 = vst.msk [vmem:[#allocation3 + $0x8] sm:$0xff] %vm34_vm3, %v789_v38  ;;  %185 = vperm.xlu1 %513, %v789_v38   ;;  %v163_v32 = vsub.f32 %v783_v36, %v789_v38 }
 0x16a   :  { %281 = vperm.xlu1 %513, %v760_v18  }
 0x16e   :  { %228 = vperm.xlu1 %513, %v798_v39   ;;  %v169_v39 = vmul.f32 0.5, %v163_v32 }
 0x170   :  { %v172_v41 = vmul.f32 1.442695, %v169_v39 }
 0x172   :  { %231 = vperm.xlu1 %513, %v804_v40   ;;  %v268_v40 = vsub.f32 %v749_v13, %v752_v15 }
 0x1dd   :  { %v181_v42 = vpop.permute.xlu0 %180 }
 0x1de   :  { %v188_v43 = vsub.f32 %v766_v27, %v181_v42  ;;  %v269_v42 = vsub.f32 %v754_v16, %v760_v18 }
 0x1e0   :  { %v190_v44 = vmul.f32 1.442695, %v188_v43  ;;  %v206_v45 = vmul.f32 0.5, %v188_v43  ;;  %v166_v43 = vmul.f32 1.442695, %v163_v32 }
 0x1e1   :  { %v186_v46 = vpop.permute.xlu1 %185  ;;  %v272_v33 = vmul.f32 1.442695, %v269_v42 }
 0x1e2   :  { %517 = vpow2.f32 %v190_v44  ;;  %v208_v48 = vmul.f32 1.442695, %v206_v45  ;;  %v189_v49 = vsub.f32 %v772_v30, %v186_v46  ;;  %v270_v44 = vmul.f32 1.442695, %v268_v40  ;;  %v174_v45 = vld [vmem:[#allocation4] sm:$0xff] }
 0x1e4   :  { %519 = vpow2.f32 %v208_v48  ;;  %v192_v50 = vmul.f32 1.442695, %v189_v49  ;;  %v207_v51 = vmul.f32 0.5, %v189_v49  ;;  %v202_v49 = vld [vmem:[#allocation5] sm:$0xff] }
 0x1e5   :  { %v282_v52 = vpop.permute.xlu1 %281 }
 0x1e6   :  { %v210_v54 = vmul.f32 1.442695, %v207_v51  ;;  %v285_v55 = vsub.f32 %v716_v7, %v282_v52  ;;  %521 = vpow2.f32 %v192_v50  ;;  %v203_v51 = vld [vmem:[#allocation5 + $0x8] sm:$0xff] }
 0x1e8   :  { %523 = vpow2.f32 %v210_v54  ;;  %v288_v56 = vmul.f32 1.442695, %v285_v55  ;;  %v175_v54 = vld [vmem:[#allocation4 + $0x8] sm:$0xff] }
 0x1e9   :  { %525 = vpow2.f32 %v286_v53  ;;  %v229_v2 = vpop.permute.xlu1 %228 }
 0x1ea   :  { %527 = vpow2.f32 %v288_v56  ;;  %vm233_vm5 = vcmp.eq.s32.totalorder %v222_v8, %v229_v2 }
 0x1eb   :  { %v235_v6 = vsel %vm233_vm5, %v766_v27, 0.0  ;;  %v833_v27 = vsel %vm358_vm8, 1.0, %v643_v1  ;;  %529 = vpow2.f32 %v164_v34  ;;  %v170_v1 = vmul.f32 1.442695, %v168_v37 }
 0x1ec   :  { %v237_v7 = vsel %vm52_vm0, %v235_v6, 0.0  ;;  %v378_v29 = vsel %vm34_vm3, %v833_v27, 0.0  ;;  %v225_v6 = vld [vmem:[#allocation9] sm:$0xff] }
 0x1ed   :  { %v232_v19 = vpop.permute.xlu1 %231  ;;  %531 = vpow2.f32 %v170_v1 }
 0x1ee   :  { %vm234_vm6 = vcmp.eq.s32.totalorder %v222_v8, %v232_v19  ;;  %533 = vpow2.f32 %v172_v41 }
 0x1ef   :  { %v518_v57 = vpop.eup %517  ;;  %v236_v24 = vsel %vm234_vm6, %v772_v30, 0.0  ;;  %v379_v30 = vadd.f32 %v378_v29, %v377_v28  ;;  %535 = vpow2.f32 %v166_v43  ;;  %v333_v43 = vmul.f32 0.5, %v781_v35 }
 0x1f0   :  { %v194_v58 = vsel %vm52_vm0, %v518_v57, 0.0  ;;  %v240_v25 = vsel %vm52_vm0, %v236_v24, 0.0  ;;  %537 = vpow2.f32 %v270_v44 }
 0x1f1   :  { %v520_v59 = vpop.eup %519  ;;  %195 = vadd.xlane.f32.xlu1 %v194_v58  ;;  %539 = vpow2.f32 %v272_v33 }
 0x1f2   :  { %v212_v62 = vsel %vm52_vm0, %v520_v59, 0.0  ;;  %v290_v59 = vld [vmem:[#allocation7] sm:$0xff] }
 0x1f3   :  { %v522_v60 = vpop.eup %521 }
 0x1f4   :  { %v197_v9 = vsel %vm52_vm0, %v522_v60, 0.0 }
 0x1f5   :  { %v524_v0 = vpop.eup %523  ;;  %213 = vadd.xlane.f32.xlu1 %v212_v62 }
 0x1f6   :  { %v215_v3 = vsel %vm52_vm0, %v524_v0, 0.0  ;;  %v526_v5 = vpop.eup %525  ;;  %v291_v0 = vld [vmem:[#allocation7 + $0x8] sm:$0xff] }
 0x1f7   :  { %216 = vadd.xlane.f32.xlu0 %v215_v3  ;;  %v528_v11 = vpop.eup %527  ;;  %v294_v12 = vsel %vm52_vm0, %v526_v5, 0.0  ;;  %v308_v14 = vmul.f32 %v526_v5, %v306_v10  ;;  %v302_v5 = vld [vmem:[#allocation8] sm:$0xff] }
 0x1f8   :  { %v297_v20 = vsel %vm52_vm0, %v528_v11, 0.0  ;;  %v309_v21 = vmul.f32 %v528_v11, %v307_v17  ;;  %v530_v36 = vpop.eup %529  ;;  %v303_v11 = vld [vmem:[#allocation8 + $0x8] sm:$0xff] }
 0x1f9   :  { %198 = vadd.xlane.f32.xlu1 %v197_v9  ;;  %v310_v22 = vsel %vm52_vm0, %v308_v14, 0.0  ;;  %v176_v46 = vmul.f32 %v530_v36, %v174_v45 }
 0x1fa   :  { %v313_v23 = vsel %vm52_vm0, %v309_v21, 0.0  ;;  %v532_v47 = vpop.eup %531 }
 0x1fb   :  { %295 = vadd.xlane.f32.xlu0 %v294_v12  ;;  %v534_v13 = vpop.eup %533  ;;  %v204_v16 = vmul.f32 %v532_v47, %v202_v49 }
 0x1fc   :  { %v536_v52 = vpop.eup %535  ;;  %v205_v56 = vmul.f32 %v534_v13, %v203_v51 }
 0x1fd   :  { %298 = vadd.xlane.f32.xlu1 %v297_v20  ;;  %v538_v57 = vpop.eup %537  ;;  %v177_v61 = vmul.f32 %v536_v52, %v175_v54 }
 0x1fe   :  { %v540_v62 = vpop.eup %539  ;;  %v292_v3 = vmul.f32 %v538_v57, %v290_v59  ;;  %v304_v14 = vmul.f32 %v538_v57, %v302_v5 }
 0x1ff   :  { %311 = vadd.xlane.f32.xlu0 %v310_v22  ;;  %v293_v9 = vmul.f32 %v540_v62, %v291_v0  ;;  %v305_v20 = vmul.f32 %v540_v62, %v303_v11 }
 0x201   :  { %314 = vadd.xlane.f32.xlu1 %v313_v23 }
 0x203   :  { %238 = vadd.xlane.f32.xlu0 %v237_v7 }
 0x205   :  { %241 = vadd.xlane.f32.xlu1 %v240_v25  ;;  %v226_v25 = vld [vmem:[#allocation9 + $0x8] sm:$0xff] }
 0x209   :  { %380 = vadd.xlane.f32.xlu1 %v379_v30 }
 0x27a   :  { %v196_v48 = vpop.xlane.xlu1 %195 }
 0x27b   :  { %v200_v50 = vadd.f32 %v196_v48, %v176_v46  ;;  %v334_v48 = vmul.f32 0.5, %v789_v38 }
 0x27d   :  { %248 = vst.msk [vmem:[#allocation4] sm:$0xff] %vm34_vm3, %v200_v50  ;;  %541 = vlog2.f32 %v200_v50 }
 0x27e   :  { %v214_v53 = vpop.xlane.xlu1 %213 }
 0x27f   :  { %v218_v55 = vadd.f32 %v214_v53, %v204_v16 }
 0x280   :  { %v217_v58 = vpop.xlane.xlu0 %216 }
 0x281   :  { %250 = vst.msk [vmem:[#allocation5] sm:$0xff] %vm34_vm3, %v218_v55  ;;  %v219_v60 = vadd.f32 %v217_v58, %v205_v56  ;;  %543 = vlog2.f32 %v218_v55  ;;  %v389_v56 = vld [vmem:[%s891_s4] sm:$0xff] }
 0x282   :  { %v199_v63 = vpop.xlane.xlu1 %198 }
 0x283   :  { %251 = vst.msk [vmem:[#allocation5 + $0x8] sm:$0xff] %vm34_vm3, %v219_v60  ;;  %v201_v2 = vadd.f32 %v199_v63, %v177_v61  ;;  %545 = vlog2.f32 %v219_v60 }
 0x284   :  { %v296_v4 = vpop.xlane.xlu0 %295 }
 0x285   :  { %249 = vst.msk [vmem:[#allocation4 + $0x8] sm:$0xff] %vm34_vm3, %v201_v2  ;;  %547 = vlog2.f32 %v201_v2  ;;  %v300_v8 = vadd.f32 %v296_v4, %v292_v3 }
 0x286   :  { %v299_v10 = vpop.xlane.xlu1 %298 }
 0x287   :  { %320 = vst.msk [vmem:[#allocation7] sm:$0xff] %vm34_vm3, %v300_v8  ;;  %549 = vlog2.f32 %v300_v8  ;;  %v301_v12 = vadd.f32 %v299_v10, %v293_v9 }
 0x288   :  { %551 = vrcp.f32 %v300_v8  ;;  %v312_v17 = vpop.xlane.xlu0 %311 }
 0x289   :  { %321 = vst.msk [vmem:[#allocation7 + $0x8] sm:$0xff] %vm34_vm3, %v301_v12  ;;  %553 = vlog2.f32 %v301_v12  ;;  %v316_v19 = vadd.f32 %v312_v17, %v304_v14 }
 0x28a   :  { %v542_v21 = vpop.eup %541  ;;  %555 = vrcp.f32 %v301_v12  ;;  %v315_v22 = vpop.xlane.xlu1 %314 }
 0x28b   :  { %v328_v23 = vmul.f32 0.6931472, %v542_v21  ;;  %322 = vst.msk [vmem:[#allocation8] sm:$0xff] %vm34_vm3, %v316_v19  ;;  %v317_v24 = vadd.f32 %v315_v22, %v305_v20 }
 0x28c   :  { %v239_v7 = vpop.xlane.xlu0 %238 }
 0x28d   :  { %323 = vst.msk [vmem:[#allocation8 + $0x8] sm:$0xff] %vm34_vm3, %v317_v24  ;;  %v243_v28 = vadd.f32 %v239_v7, %v225_v6  ;;  %v331_v31 = vadd.f32 %v328_v23, %v781_v35 }
 0x28e   :  { %v242_v29 = vpop.xlane.xlu1 %241  ;;  %v544_v30 = vpop.eup %543 }
 0x28f   :  { %252 = vst.msk [vmem:[#allocation9] sm:$0xff] %vm34_vm3, %v243_v28  ;;  %v244_v32 = vadd.f32 %v242_v29, %v226_v25  ;;  %v336_v39 = vmul.f32 0.6931472, %v544_v30  ;;  %v347_v40 = vsub.f32 %v331_v31, %v243_v28 }
 0x290   :  { %v546_v34 = vpop.eup %545 }
 0x291   :  { %253 = vst.msk [vmem:[#allocation9 + $0x8] sm:$0xff] %vm34_vm3, %v244_v32  ;;  %v338_v42 = vmul.f32 0.6931472, %v546_v34  ;;  %v339_v46 = vadd.f32 %v336_v39, %v333_v43  ;;  %v363_v51 = vmul.f32 %v830_v26, %v347_v40 }
 0x292   :  { %v548_v37 = vpop.eup %547 }
 0x293   :  { %v330_v1 = vmul.f32 0.6931472, %v548_v37  ;;  %v340_v53 = vadd.f32 %v338_v42, %v334_v48  ;;  %v365_v58 = vsel %vm34_vm3, %v363_v51, 0.0 }
 0x294   :  { %v550_v41 = vpop.eup %549 }
 0x295   :  { %v552_v44 = vpop.eup %551  ;;  %v342_v33 = vmul.f32 0.6931472, %v550_v41  ;;  %v332_v36 = vadd.f32 %v330_v1, %v789_v38 }
 0x296   :  { %v554_v45 = vpop.eup %553  ;;  %v350_v47 = vmul.f32 %v552_v44, %v316_v19 }
 0x297   :  { %v556_v49 = vpop.eup %555  ;;  %v344_v50 = vmul.f32 0.6931472, %v554_v45  ;;  %v348_v13 = vsub.f32 %v332_v36, %v244_v32  ;;  %v345_v16 = vadd.f32 %v342_v33, %v752_v15  ;;  %v390_v15 = vld [vmem:[%s891_s4 + $0x8] sm:$0xff] }
 0x298   :  { %v353_v52 = vadd.f32 %v350_v47, %v339_v46  ;;  %v352_v54 = vmul.f32 %v556_v49, %v317_v24 }
 0x299   :  { %v364_v35 = vmul.f32 %v833_v27, %v348_v13  ;;  %v346_v55 = vadd.f32 %v344_v50, %v760_v18 }
 0x29a   :  { %v354_v57 = vadd.f32 %v352_v54, %v340_v53  ;;  %v355_v38 = vsub.f32 %v353_v52, %v345_v16 }
 0x29b   :  { %v366_v59 = vsel %vm34_vm3, %v364_v35, 0.0 }
 0x29c   :  { %v367_v26 = vadd.f32 %v366_v59, %v365_v58  ;;  %v356_v60 = vsub.f32 %v354_v57, %v346_v55  ;;  %v391_v61 = vmul.f32 %v389_v56, %v355_v38 }
 0x29e   :  { %368 = vadd.xlane.f32.xlu0 %v367_v26  ;;  %v392_v27 = vmul.f32 %v390_v15, %v356_v60  ;;  %v393_v18 = vsel %vm34_vm3, %v391_v61, 0.0 }
 0x2a0   :  { %v394_v62 = vsel %vm34_vm3, %v392_v27, 0.0 }
 0x2a1   :  { %v395_v63 = vadd.f32 %v394_v62, %v393_v18 }
 0x2a3   :  { %396 = vadd.xlane.f32.xlu0 %v395_v63 }
 0x2a4   :  { %568 = shalt.err (!%p565_p4)
}
 0x2a5   :  { %s648_s4 = smov 64   ;;  %s649_s20 = smov 4   ;;  %v381_v0 = vpop.xlane.xlu1 %380 }
 0x2a6   :  { %425 = dma.vmem_to_hbm [thread:$0]  %s420_s18, 128, %s892_s5, [#allocation11], %s648_s4, %s648_s4, %s649_s20   ;;  %v382_v2 = vrot.slane %v381_v0, 4 }
 0x2a7   :  { %s650_s5 = smov [#allocation12]   ;;  %s651_s24 = smov [#allocation14]  }
 0x2a8   :  { %v383_v3 = vadd.f32 %v382_v2, %v381_v0  ;;  %s432_s23 = sshll.u32 %s650_s5, 4  ;;  %s442_s25 = sshll.u32 %s651_s24, 4  ;;  %s433_s23 = int_to_ptr.vmem [resolvable:$true] %s432_s23  ;;  %s443_s25 = int_to_ptr.vmem [resolvable:$true] %s442_s25 }
 0x2a9   :  { %s652_s28 = smov [#allocation15]   ;;  %s577_s30 = scalar_lea.vmem %s433_s23, 128 }
 0x2aa   :  { %v384_v4 = vrot.slane %v383_v3, 2  ;;  %s452_s29 = sshll.u32 %s652_s28, 4  ;;  %p578_p5 = scmp.ne.s32.totalorder %s433_s23, %s577_s30  ;;  %s453_s29 = int_to_ptr.vmem [resolvable:$true] %s452_s29 }
 0x2ab   :  { %p582_p6 = scmp.lt.s32.totalorder %s433_s23, %s433_s23  ;;  %p583_p7 = scmp.lt.s32.totalorder %s577_s30, %s577_s30 }
 0x2ac   :  { %v385_v10 = vadd.f32 %v384_v4, %v383_v3 }
 0x2ad   :  { %p584_p8 = por %p583_p7, %p582_p6 }
 0x2ae   :  { %v386_v20 = vrot.slane %v385_v10, 1 }
 0x2af   :  { %p585_p9 = pnand %p584_p8, %p578_p5 }
 0x2b0   :  { %v387_v24 = vadd.f32 %v386_v20, %v385_v10 }
 0x327   :  { %v369_v5 = vpop.xlane.xlu0 %368 }
 0x328   :  { %v370_v8 = vrot.slane %v369_v5, 4 }
 0x32a   :  { %v371_v9 = vadd.f32 %v370_v8, %v369_v5 }
 0x32c   :  { %v372_v11 = vrot.slane %v371_v9, 2  ;;  %v397_v12 = vpop.xlane.xlu0 %396 }
 0x32d   :  { %v398_v14 = vrot.slane %v397_v12, 4 }
 0x32e   :  { %v373_v17 = vadd.f32 %v372_v11, %v371_v9 }
 0x32f   :  { %v399_v19 = vadd.f32 %v398_v14, %v397_v12 }
 0x330   :  { %v374_v21 = vrot.slane %v373_v17, 1 }
 0x331   :  { %v400_v22 = vrot.slane %v399_v19, 2 }
 0x332   :  { %v375_v6 = vadd.f32 %v374_v21, %v373_v17 }
 0x333   :  { %v401_v23 = vadd.f32 %v400_v22, %v399_v19 }
 0x334   :  { %496 = vpush %v375_v6 }
 0x335   :  { %498 = vpush %v387_v24  ;;  %v402_v7 = vrot.slane %v401_v23, 1 }
 0x337   :  { %v403_v25 = vadd.f32 %v402_v7, %v401_v23 }
 0x339   :  { %500 = vpush %v403_v25 }
 0x365   :  { %s497_s26 = spop %496 }
 0x366   :  { %v405_v28 = vstv %s497_s26  ;;  %s499_s27 = spop %498 }
 0x367   :  { %407 = vst [vmem:[#allocation12] sm:$0xff] %v405_v28  ;;  %v408_v29 = vstv %s499_s27 }
 0x368   :  { %410 = vst [vmem:[#allocation14] sm:$0xff] %v408_v29 }
 0x369   :  { %588 = shalt.err (!%p585_p9)
}
 0x36a   :  { %435 = dma.vmem_to_hbm [thread:$0]  %s433_s23, 128, %s893_s6, [#allocation13]  }
 0x36b   :  { %s597_s2 = scalar_lea.vmem %s443_s25, 128  ;;  %p602_p11 = scmp.lt.s32.totalorder %s443_s25, %s443_s25 }
 0x36c   :  { %p598_p10 = scmp.ne.s32.totalorder %s443_s25, %s597_s2  ;;  %p603_p12 = scmp.lt.s32.totalorder %s597_s2, %s597_s2 }
 0x36e   :  { %p604_p13 = por %p603_p12, %p602_p11 }
 0x370   :  { %p605_p0 = pnand %p604_p13, %p598_p10 }
 0x372   :  { %608 = shalt.err (!%p605_p0)
}
 0x373   :  { %445 = dma.vmem_to_hbm [thread:$0]  %s443_s25, 128, %s894_s7, [#allocation13]  }
 0x374   :  { %s501_s1 = spop %500  ;;  %s617_s12 = scalar_lea.vmem %s453_s29, 128 }
 0x375   :  { %v411_v30 = vstv %s501_s1  ;;  %p618_p1 = scmp.ne.s32.totalorder %s453_s29, %s617_s12  ;;  %p622_p2 = scmp.lt.s32.totalorder %s453_s29, %s453_s29 }
 0x376   :  { %413 = vst [vmem:[#allocation15] sm:$0xff] %v411_v30  ;;  %p623_p3 = scmp.lt.s32.totalorder %s617_s12, %s617_s12 }
 0x378   :  { %p624_p4 = por %p623_p3, %p622_p2 }
 0x37a   :  { %p625_p5 = pnand %p624_p4, %p618_p1 }
 0x37c   :  { %628 = shalt.err (!%p625_p5)
}
 0x37d   :  { %455 = dma.vmem_to_hbm [thread:$0]  %s453_s29, 128, %s895_s8, [#allocation16]  }
 0x37e   :  { %637 = dma.done.wait [#allocation11], 128  }
 0x37f   :  { %638 = vsyncadd [#allocation11], 4294967168 }
 0x380   :  { %639 = dma.done.wait [#allocation13], 256  }
 0x381   :  { %640 = vsyncadd [#allocation13], 4294967040 }
 0x382   :  { %641 = dma.done.wait [#allocation16], 128  }
 0x383   :  { %642 = vsyncadd [#allocation16], 4294967168 }
 0x384   :  { %468 = vsyncpa [#allocation11], 1 }
 0x385   :  { %469 = vsyncpa [#allocation13], 1 }
 0x386   :  { %470 = vsyncpa [#allocation16], 1 }

</bundles_post_ra>
